<compile_context>
chip_gen: v5e
topology: v5e:2x2
jax: 0.10.0
libtpu: 0.0.40
codegen_flags: <defaults>
</compile_context>

<pallas_src>
import jax
import jax.numpy as jnp
from jax.experimental import pallas as pl
from jax.experimental.pallas import tpu as pltpu


def _round_up(x, m):
    return ((x + m - 1) // m) * m


def _mlp_grl_kernel(x_ref, w1_ref, b1_ref, w2_ref, b2_ref, o_ref):
    # GradientReversal is identity in the forward pass (only flips gradients),
    # so the forward hot path is just the fused 2-layer MLP.
    # TODO(synk): backward-pass gradient reversal (scale grads by -alpha) is an
    # autograd concern and is not expressible in a forward Pallas kernel.
    x = x_ref[...]                                                # [TB, D]
    h = jnp.dot(x, w1_ref[...],
                preferred_element_type=jnp.float32)               # [TB, 128] f32
    h = jnp.maximum(h + b1_ref[...], 0.0)                         # bias + ReLU in f32
    h = h.astype(w2_ref.dtype)                                    # cast for 2nd MXU pass
    out = jnp.dot(h, w2_ref[...],
                  preferred_element_type=jnp.float32) + b2_ref[...]  # [TB, C_pad] f32
    o_ref[...] = out.astype(o_ref.dtype)


def fc_classifier_nolazy_grl(x, w1, b1, w2, b2, *, compute_dtype=None, block_b=512):
    """Forward of FC_Classifier_NoLazy_GRL.

    x:  [B, input_dim]
    w1: [input_dim, 100]   (transposed vs PyTorch [100, input_dim])
    b1: [100] or [1, 100]
    w2: [100, n_classes]   (transposed vs PyTorch)
    b2: [n_classes] or [1, n_classes]
    returns [B, n_classes] in x.dtype
    """
    B, D = x.shape
    HID_IN = w1.shape[1]
    C = w2.shape[1]
    cdt = jnp.dtype(compute_dtype) if compute_dtype is not None else jnp.dtype(x.dtype)

    HID = _round_up(HID_IN, 128)      # 100 -> 128 (MXU-aligned hidden lane axis)
    C_PAD = _round_up(C, 128)         # lane-dense output store

    # Zero-pad weights/biases once in the wrapper (not per grid step).
    w1_p = jnp.zeros((D, HID), cdt).at[:, :HID_IN].set(w1.astype(cdt))
    b1_p = jnp.zeros((1, HID), jnp.float32).at[:, :HID_IN].set(
        b1.reshape(1, -1).astype(jnp.float32))
    w2_p = jnp.zeros((HID, C_PAD), cdt).at[:HID_IN, :C].set(w2.astype(cdt))
    b2_p = jnp.zeros((1, C_PAD), jnp.float32).at[:, :C].set(
        b2.reshape(1, -1).astype(jnp.float32))

    # Pick batch tile: multiple of 8 sublanes, capped at block_b, shrunk until
    # (double-buffered x tile + double-buffered out tile + resident weights)
    # fits a conservative VMEM budget (safe for v7x's smaller VMEM).
    itemsize = jnp.dtype(cdt).itemsize
    TB = _round_up(min(block_b, _round_up(B, 8)), 8)
    budget = 20 * 1024 * 1024

    def footprint(tb):
        return (2 * tb * D * itemsize          # x tiles (double-buffered)
                + 2 * tb * C_PAD * 4           # out tiles (f32, double-buffered)
                + D * HID * itemsize           # resident W1
                + HID * C_PAD * itemsize       # resident W2
                + (HID + C_PAD) * 4)           # resident biases

    while TB > 8 and footprint(TB) > budget:
        TB = _round_up(max(TB // 2, 8), 8)

    # Pad batch so every grid step sees a full tile.
    B_PAD = _round_up(B, TB)
    x_p = x.astype(cdt)
    if B_PAD != B:
        x_p = jnp.zeros((B_PAD, D), cdt).at[:B].set(x_p)

    grid = (B_PAD // TB,)
    out = pl.pallas_call(
        _mlp_grl_kernel,
        out_shape=jax.ShapeDtypeStruct((B_PAD, C_PAD), jnp.float32),
        grid=grid,
        in_specs=[
            pl.BlockSpec((TB, D), lambda i: (i, 0)),       # x: batch-tiled
            pl.BlockSpec((D, HID), lambda i: (0, 0)),      # W1: resident
            pl.BlockSpec((1, HID), lambda i: (0, 0)),      # b1: resident
            pl.BlockSpec((HID, C_PAD), lambda i: (0, 0)),  # W2: resident
            pl.BlockSpec((1, C_PAD), lambda i: (0, 0)),    # b2: resident
        ],
        out_specs=pl.BlockSpec((TB, C_PAD), lambda i: (i, 0)),
        compiler_params=pltpu.CompilerParams(
            dimension_semantics=("parallel",)),
    )(x_p, w1_p, b1_p, w2_p, b2_p)

    # Slice off batch / class padding; return in the input dtype.
    return out[:B, :C].astype(x.dtype)


def init_params(key, input_dim, n_classes, hidden=100, dtype=jnp.float32):
    """Deterministic init mimicking PyTorch nn.Linear default:
       U(-1/sqrt(fan_in), 1/sqrt(fan_in)) for both weights and biases."""
    k1, k2, k3, k4 = jax.random.split(key, 4)
    bound1 = 1.0 / jnp.sqrt(jnp.array(input_dim, dtype))
    bound2 = 1.0 / jnp.sqrt(jnp.array(hidden, dtype))
    # Stored as [in, out] (transpose of PyTorch's [out, in]).
    w1 = jax.random.uniform(k1, (input_dim, hidden), dtype, -bound1, bound1)
    b1 = jax.random.uniform(k2, (1, hidden), dtype, -bound1, bound1)
    w2 = jax.random.uniform(k3, (hidden, n_classes), dtype, -bound2, bound2)
    b2 = jax.random.uniform(k4, (1, n_classes), dtype, -bound2, bound2)
    return w1, b1, w2, b2


if __name__ == "__main__":
    key = jax.random.PRNGKey(0)
    kx, kp = jax.random.split(key)

    batch = 16
    input_dim = 32
    n_classes = 10

    x = jax.random.normal(kx, (batch, input_dim), jnp.float32)
    w1, b1, w2, b2 = init_params(kp, input_dim, n_classes)

    # Plain-JAX reference (GRL forward == identity).
    ref = jnp.maximum(x @ w1 + b1, 0.0) @ w2 + b2

    # f32 path, small block_b so the batch grid (weights-resident) is exercised.
    out = fc_classifier_nolazy_grl(x, w1, b1, w2, b2, block_b=8)
    out = jax.block_until_ready(out)
    assert out.shape == (batch, n_classes)
    assert jnp.allclose(out, ref, atol=1e-5, rtol=1e-5)

    # bf16-operand path (f32 accumulate / epilogue) — looser tolerance.
    out_bf16 = fc_classifier_nolazy_grl(x, w1, b1, w2, b2,
                                        compute_dtype=jnp.bfloat16)
    out_bf16 = jax.block_until_ready(out_bf16)
    assert out_bf16.shape == (batch, n_classes)
    assert jnp.allclose(out_bf16, ref, atol=5e-2, rtol=5e-2)

    print("KERNEL_OK")
</pallas_src>

<mosaic_0001>
module attributes {stable_mosaic.version = 11 : i64} {
  func.func @_mlp_grl_kernel(%arg0: i32, %arg1: memref<8x32xf32, #tpu.memory_space<vmem>>, %arg2: memref<32x128xf32, #tpu.memory_space<vmem>>, %arg3: memref<1x128xf32, #tpu.memory_space<vmem>>, %arg4: memref<128x128xf32, #tpu.memory_space<vmem>>, %arg5: memref<1x128xf32, #tpu.memory_space<vmem>>, %arg6: memref<8x128xf32, #tpu.memory_space<vmem>>) attributes {dimension_semantics = [#tpu.dimension_semantics<parallel>], iteration_bounds = array<i64: 2>, scalar_prefetch = 0 : i64, scratch_operands = 0 : i64, tpu.core_type = #tpu.core_type<tc>, window_params = [{transform_indices = @transform_0, window_bounds = array<i64: 8, 32>}, {pipeline_mode = #tpu.pipeline_mode<synchronous>, transform_indices = @transform_1, window_bounds = array<i64: 32, 128>}, {pipeline_mode = #tpu.pipeline_mode<synchronous>, transform_indices = @transform_2, window_bounds = array<i64: 1, 128>}, {pipeline_mode = #tpu.pipeline_mode<synchronous>, transform_indices = @transform_3, window_bounds = array<i64: 128, 128>}, {pipeline_mode = #tpu.pipeline_mode<synchronous>, transform_indices = @transform_4, window_bounds = array<i64: 1, 128>}, {transform_indices = @transform_5, window_bounds = array<i64: 8, 128>}]} {
    %c0 = arith.constant 0 : index
    %c0_0 = arith.constant 0 : index
    %0 = vector.load %arg1[%c0, %c0_0] : memref<8x32xf32, #tpu.memory_space<vmem>>, vector<8x32xf32>
    %c0_1 = arith.constant 0 : index
    %c0_2 = arith.constant 0 : index
    %1 = vector.load %arg2[%c0_1, %c0_2] : memref<32x128xf32, #tpu.memory_space<vmem>>, vector<32x128xf32>
    %cst = arith.constant dense<0.000000e+00> : vector<8x128xf32>
    %2 = tpu.matmul %0, %1, %cst {dimension_numbers = #tpu.dot_dimension_numbers<[1], [0], [0], [1], [0, 0, 1, 1], [], []>} : vector<8x32xf32>, vector<32x128xf32>, vector<8x128xf32> -> vector<8x128xf32>
    %c0_3 = arith.constant 0 : index
    %c0_4 = arith.constant 0 : index
    %3 = vector.load %arg3[%c0_3, %c0_4] : memref<1x128xf32, #tpu.memory_space<vmem>>, vector<1x128xf32>
    %4 = vector.broadcast %3 : vector<1x128xf32> to vector<8x128xf32>
    %5 = arith.addf %2, %4 : vector<8x128xf32>
    %cst_5 = arith.constant 0.000000e+00 : f32
    %6 = vector.broadcast %cst_5 : f32 to vector<8x128xf32>
    %7 = arith.maximumf %5, %6 : vector<8x128xf32>
    %c0_6 = arith.constant 0 : index
    %c0_7 = arith.constant 0 : index
    %8 = vector.load %arg4[%c0_6, %c0_7] : memref<128x128xf32, #tpu.memory_space<vmem>>, vector<128x128xf32>
    %cst_8 = arith.constant dense<0.000000e+00> : vector<8x128xf32>
    %9 = tpu.matmul %7, %8, %cst_8 {dimension_numbers = #tpu.dot_dimension_numbers<[1], [0], [0], [1], [0, 0, 1, 1], [], []>} : vector<8x128xf32>, vector<128x128xf32>, vector<8x128xf32> -> vector<8x128xf32>
    %c0_9 = arith.constant 0 : index
    %c0_10 = arith.constant 0 : index
    %10 = vector.load %arg5[%c0_9, %c0_10] : memref<1x128xf32, #tpu.memory_space<vmem>>, vector<1x128xf32>
    %11 = vector.broadcast %10 : vector<1x128xf32> to vector<8x128xf32>
    %12 = arith.addf %9, %11 : vector<8x128xf32>
    %c0_11 = arith.constant 0 : index
    %c0_12 = arith.constant 0 : index
    %13 = vector.load %arg6[%c0_11, %c0_12] : memref<8x128xf32, #tpu.memory_space<vmem>>, vector<8x128xf32>
    tpu.vector_store %arg6[%c0_11, %c0_12], %12 {strides = array<i32>} : memref<8x128xf32, #tpu.memory_space<vmem>>, vector<8x128xf32>,
    return
  }
  func.func @transform_0(%arg0: i32) -> (i32, i32) {
    %c0_i32 = arith.constant 0 : i32
    %c0_i32_0 = arith.constant 0 : i32
    return %arg0, %c0_i32 : i32, i32
  }
  func.func @transform_1(%arg0: i32) -> (i32, i32) {
    %c0_i32 = arith.constant 0 : i32
    %c0_i32_0 = arith.constant 0 : i32
    %c0_i32_1 = arith.constant 0 : i32
    return %c0_i32, %c0_i32_0 : i32, i32
  }
  func.func @transform_2(%arg0: i32) -> (i32, i32) {
    %c0_i32 = arith.constant 0 : i32
    %c0_i32_0 = arith.constant 0 : i32
    %c0_i32_1 = arith.constant 0 : i32
    return %c0_i32, %c0_i32_0 : i32, i32
  }
  func.func @transform_3(%arg0: i32) -> (i32, i32) {
    %c0_i32 = arith.constant 0 : i32
    %c0_i32_0 = arith.constant 0 : i32
    %c0_i32_1 = arith.constant 0 : i32
    return %c0_i32, %c0_i32_0 : i32, i32
  }
  func.func @transform_4(%arg0: i32) -> (i32, i32) {
    %c0_i32 = arith.constant 0 : i32
    %c0_i32_0 = arith.constant 0 : i32
    %c0_i32_1 = arith.constant 0 : i32
    return %c0_i32, %c0_i32_0 : i32, i32
  }
  func.func @transform_5(%arg0: i32) -> (i32, i32) {
    %c0_i32 = arith.constant 0 : i32
    %c0_i32_0 = arith.constant 0 : i32
    return %arg0, %c0_i32 : i32, i32
  }
}

</mosaic_0001>

<bundles_post_ra>
// kernel: tpu_custom_call.1
= control target key start
LH: loop header
LB: loop body
LE: loop exit
PB: predicated region body
PF: predicated region fallthrough
CT: control target
= control target key end

     0   :  { %10 = vsyncpa [#allocation3], 0  ;;  %s894_s0 = inlined_call_operand.hbm [shape: f32[16,32], index: 0, kind: input, shape index: {}]   ;;  %s895_s1 = inlined_call_operand.hbm [shape: f32[32,128], index: 1, kind: input, shape index: {}]   ;;  %s896_s2 = inlined_call_operand.vmem [shape: f32[1,128], index: 2, kind: input, shape index: {}]   ;;  %s897_s3 = inlined_call_operand.hbm [shape: f32[128,128], index: 3, kind: input, shape index: {}]   ;;  %s898_s4 = inlined_call_operand.vmem [shape: f32[1,128], index: 4, kind: input, shape index: {}]   ;;  %s899_s5 = inlined_call_operand.hbm [shape: f32[16,128], index: 5, kind: output, shape index: {}]  }
   0x1   :  { %12 = vsyncpa [#allocation3 + $0x1], 0 }
   0x2   :  { %13 = vsyncpa [#allocation6], 0 }
   0x3   :  { %14 = vsyncpa [#allocation4], 0 }
   0x4   :  { %16 = vsyncpa [#allocation4 + $0x1], 0  ;;  %s739_s18 = smov 0   ;;  %s741_s19 = smov 0  }
   0x5   :  { %s743_s20 = smov 0   ;;  %s745_s21 = smov 0  }
   0x6 LB: > { %s174_s24 = sshll.u32 %s895_s1, 4  ;;  %s763_s25 = sadd.s32 4294967295, %s703_s21   ;;  %s703_s21 = sphi %s745_s21, %s910_s21   ;;  %s699_s20 = sphi %s743_s20, %s909_s20   ;;  %s695_s19 = sphi %s741_s19, %s908_s19   ;;  %s691_s18 = sphi %s739_s18, %s907_s18   ;;  %s175_s24 = int_to_ptr.hbm [resolvable:$true] %s174_s24 }
   0x7   : > { %p456_p0 = scmp.ge.s32.totalorder %s703_s21, 1  ;;  %p43_p1 = scmp.eq.s32.totalorder %s763_s25, 0 }
   0x8   : > { %p163_p2 = scmp.lt.s32.totalorder %s703_s21, 3  ;;  %s705_s27 = smov [#allocation5]  }
   0x9   : > { %s176_s28 = sshll.u32 %s705_s27, 4  ;;  %s191_s6 = sshll.u32 %s897_s3, 4  ;;  %s177_s28 = int_to_ptr.vmem [resolvable:$true] %s176_s28  ;;  %s192_s6 = int_to_ptr.hbm [resolvable:$true] %s191_s6 }
   0xa   : > { %p768_p3 = pnand %p456_p0, %p163_p2  ;;  %s706_s7 = smov [#allocation7]  }
   0xb   : > { %s193_s8 = sshll.u32 %s706_s7, 4  ;;  %s707_s9 = smov 128   ;;  %s194_s8 = int_to_ptr.vmem [resolvable:$true] %s193_s8 }
   0xc   : > { %p484_p4 = pneg %p768_p3  ;;  %s708_s10 = smov 8  }
   0xd   : > { %s455_s11 = sadd.s32 4294967294, %s703_s21   ;;  %s782_s12 = sadd.s32 1, %s703_s21  }
   0xe   : > { %p485_p6 = pnand %p484_p4, %p43_p1  ;;  %s26_s13 = ssub.s32 %s703_s21, %s782_s12 }
   0xf   : > { %s29_s14 = sadd.s32 1, %s699_s20  ;;  %p27_p7 = scmp.eq.s32.totalorder %s26_s13, 0 }
  0x10   : > { %487 = dma.hbm_to_vmem [thread:$0]  (!%p485_p6), %s175_s24, 512, %s177_s28, [#allocation6], %s707_s9, %s707_s9, %s708_s10  }
  0x11   : > { %490 = dma.hbm_to_vmem [thread:$0]  (!%p485_p6), %s192_s6, 2048, %s194_s8, [#allocation6], %s707_s9, %s707_s9, %s708_s10  }
  0x12   : > { %p36_p8 = scmp.ne.s32.totalorder %s699_s20, %s695_s19  ;;  %p37_p9 = scmp.eq.s32.totalorder %s703_s21, 0 }
  0x13   : > { %p42_p10 = scmp.ne.s32.totalorder %s695_s19, %s691_s18  ;;  %p150_p13 = scmp.eq.s32.totalorder %s763_s25, 1 }
  0x14   : > { %s793_s15 = scalar_select %p27_p7, %s699_s20, %s29_s14  }
  0x15   : > { %p795_p11 = por %p37_p9, %p36_p8  ;;  %p801_p12 = por %p43_p1, %p42_p10 }
  0x16   : > { %p156_p0 = scmp.eq.s32.totalorder %s455_s11, 1  ;;  %p501_p2 = scmp.lt.s32.totalorder %s703_s21, 2 }
  0x17   : > { %s210_s22 = sand.u32 1, %s699_s20   ;;  %p808_p4 = por %p150_p13, %p36_p8 }
  0x18   : > { %p812_p6 = por %p156_p0, %p42_p10  ;;  %s460_s27 = sshll.u32 %s210_s22, 3 }
  0x19   : > { %s461_s28 = sshll.u32 %s703_s21, 3  ;;  %s214_s7 = scalar_lea.vmem [#allocation2], %s460_s27 }
  0x1a   : > { %s218_s6 = scalar_lea.hbm %s894_s0, %s461_s28  ;;  %s222_s8 = sshll.u32 %s214_s7, 4  ;;  %s223_s8 = int_to_ptr.vmem [resolvable:$true] %s222_s8 }
  0x1b   : > { %s220_s9 = sshll.u32 %s218_s6, 4  ;;  %p822_p7 = pnand %p501_p2, %p795_p11  ;;  %s221_s9 = int_to_ptr.hbm [resolvable:$true] %s220_s9 }
  0x1c   : > { %s211_s11 = scalar_lea.sflag [#allocation3], %s210_s22  ;;  %s603_s13 = sshra.s32 %s221_s9, 4  ;;  %s604_s13 = int_to_ptr.hbm [resolvable:$true] %s603_s13 }
  0x1d   : > { %s605_s14 = scalar_lea.hbm %s604_s13, 8  ;;  %p607_p9 = pneg %p822_p7 }
  0x1e   : > { %p606_p8 = scmp.ne.s32.totalorder %s604_s13, %s605_s14  ;;  %s610_s29 = scalar_lea.hbm %s894_s0, 16 }
  0x1f   : > { %p611_p11 = scmp.lt.s32.totalorder %s604_s13, %s894_s0  ;;  %p612_p0 = scmp.lt.s32.totalorder %s610_s29, %s605_s14 }
  0x20   : > { %p608_p10 = pnand %p607_p9, %p606_p8 }
  0x21   : > { %p613_p2 = por %p612_p0, %p611_p11 }
  0x22   : > { %p609_p13 = pneg %p608_p10 }
  0x24   : > { %p614_p5 = pnand %p613_p2, %p609_p13 }
  0x26   : > { %617 = shalt.err (!%p614_p5)
}
  0x27   : > { %494 = dma.hbm_to_vmem [thread:$0]  (!%p822_p7), %s221_s9, 128, %s223_s8, %s211_s11  }
  0x28   : > { %231 = sbr.rel (%p768_p3) target bundleno = 317 (0x13d), region = 40  ;;  %s839_s22 = sand.u32 (!%p768_p3), 1, %s695_s19  }
  0x29   : > { %s463_s6 = sshll.u32 (!%p768_p3), %s839_s22, 3  ;;  %s234_s7 = scalar_lea.sflag (!%p768_p3), [#allocation3], %s839_s22 }
  0x2a   : > { %s237_s13 = scalar_lea.vmem (!%p768_p3), [#allocation2], %s463_s6 }
  0x2d   : > { %678 = dma.done.wait (%p801_p12), %s234_s7, 128  }
  0x2e   : > { %680 = vsyncadd (%p801_p12), %s234_s7, 4294967168 }
  0x2f   : > { %682 = dma.done.wait (%p43_p1), [#allocation6], 2560  }
  0x30   : > { %684 = vsyncadd (%p43_p1), [#allocation6], 4294964736  ;;  %v279_v0 = vld [vmem:[#allocation5 + $0x18] sm:$0xff]  ;;  %v278_v1 = vld [vmem:[#allocation5 + $0x10] sm:$0xff]  ;;  %vm284_vm0 = vcmask 261120   ;;  %s469_s8 = sshll.u32 %s763_s25, 3 }
  0x31   : > { %300 = vmatpush.msra.mxu0 %v279_v0  ;;  %v324_v2 = vld [vmem:[#allocation7 + $0x78] sm:$0xff]  ;;  %v277_v3 = vld [vmem:[#allocation5 + $0x8] sm:$0xff]  ;;  %v323_v4 = vld [vmem:[#allocation7 + $0x70] sm:$0xff]  ;;  %s361_s11 = scalar_lea.hbm %s899_s5, %s469_s8  ;;  %s274_s28 = scalar_lea.vmem [#allocation8], %s463_s6 }
  0x32   : > { %329 = vmatpush.msra.mxu1 %v324_v2  ;;  %v322_v5 = vld [vmem:[#allocation7 + $0x68] sm:$0xff]  ;;  %v276_v6 = vld [vmem:[#allocation5] sm:$0xff]  ;;  %v275_v7 = vld [vmem:[%s237_s13] sm:$0xff]  ;;  %s363_s29 = sshll.u32 %s274_s28, 4  ;;  %s365_s30 = sshll.u32 %s361_s11, 4  ;;  %s364_s29 = int_to_ptr.vmem [resolvable:$true] %s363_s29  ;;  %s366_s30 = int_to_ptr.hbm [resolvable:$true] %s365_s30 }
  0x33   : > { %301 = vmatpush.msra.mxu0 %v278_v1  ;;  %v321_v8 = vld [vmem:[#allocation7 + $0x60] sm:$0xff]  ;;  %v320_v9 = vld [vmem:[#allocation7 + $0x58] sm:$0xff]  ;;  %v319_v10 = vld [vmem:[#allocation7 + $0x50] sm:$0xff]  ;;  %s351_s16 = scalar_lea.sflag [#allocation4], %s839_s22  ;;  %s647_s25 = sshra.s32 %s366_s30, 4  ;;  %s648_s25 = int_to_ptr.hbm [resolvable:$true] %s647_s25 }
  0x34   : > { %330 = vmatpush.msra.mxu1 %v323_v4  ;;  %v318_v11 = vld [vmem:[#allocation7 + $0x48] sm:$0xff]  ;;  %v317_v12 = vld [vmem:[#allocation7 + $0x40] sm:$0xff]  ;;  %v316_v13 = vld [vmem:[#allocation7 + $0x38] sm:$0xff]  ;;  %s649_s7 = scalar_lea.hbm %s648_s25, 8  ;;  %s653_s17 = scalar_lea.hbm %s899_s5, 16 }
  0x35   : > { %302 = vmatpush.msra.mxu0 %v277_v3  ;;  %v315_v14 = vld [vmem:[#allocation7 + $0x30] sm:$0xff]  ;;  %v314_v15 = vld [vmem:[#allocation7 + $0x28] sm:$0xff]  ;;  %v313_v16 = vld [vmem:[#allocation7 + $0x20] sm:$0xff]  ;;  %p650_p1 = scmp.ne.s32.totalorder %s648_s25, %s649_s7  ;;  %p654_p12 = scmp.lt.s32.totalorder %s648_s25, %s899_s5 }
  0x36   : > { %331 = vmatpush.msra.mxu1 %v322_v5  ;;  %v312_v17 = vld [vmem:[#allocation7 + $0x18] sm:$0xff]  ;;  %v311_v18 = vld [vmem:[#allocation7 + $0x10] sm:$0xff]  ;;  %v310_v19 = vld [vmem:[#allocation7 + $0x8] sm:$0xff]  ;;  %p655_p7 = scmp.lt.s32.totalorder %s653_s17, %s649_s7 }
  0x37   : > { %303 = vmatpush.msra.mxu0 %v276_v6  ;;  %v309_v20 = vld [vmem:[#allocation7] sm:$0xff]  ;;  %v541_v21 = vld [vmem:[%s896_s2] ss:$0 sm:$0xff]  ;;  %p651_p3 = pnand %p650_p1, %p808_p4 }
  0x38   : > { %467 = vmatmul.msk.f32.vlgmr.msra.gmra.mxu0 %vm284_vm0, %v275_v7  ;;  %332 = vmatpush.msra.mxu1 %v321_v8  ;;  %v542_v25 = vld [vmem:[%s898_s4] ss:$0 sm:$0xff]  ;;  %p656_p8 = por %p655_p7, %p654_p12 }
  0x39   : > { %p652_p5 = pneg %p651_p3 }
  0x3a   : > { %333 = vmatpush.msra.mxu1 %v320_v9 }
  0x3b   : > { %p657_p9 = pnand %p656_p8, %p652_p5 }
  0x3c   : > { %334 = vmatpush.msra.mxu1 %v319_v10 }
  0x3e   : > { %335 = vmatpush.msra.mxu1 %v318_v11 }
  0x40   : > { %336 = vmatpush.msra.mxu1 %v317_v12 }
  0x42   : > { %337 = vmatpush.msra.mxu1 %v316_v13 }
  0x44   : > { %338 = vmatpush.msra.mxu1 %v315_v14 }
  0x46   : > { %339 = vmatpush.msra.mxu1 %v314_v15 }
  0x48   : > { %340 = vmatpush.msra.mxu1 %v313_v16 }
  0x4a   : > { %341 = vmatpush.msra.mxu1 %v312_v17 }
  0x4c   : > { %342 = vmatpush.msra.mxu1 %v311_v18 }
  0x4e   : > { %343 = vmatpush.msra.mxu1 %v310_v19 }
  0x50   : > { %344 = vmatpush.msra.mxu1 %v309_v20 }
  0xb5   : > { %v305_v22 = vpop.f32.mrf.mxu0 }
  0xb6   : > { %v306_v23 = vadd.f32 %v541_v21, %v305_v22 }
  0xb8   : > { %v308_v24 = vmax.f32 %v306_v23, 0.0 }
  0xba   : > { %345 = vmatmul.f32.vlgmr.msra.gmra.mxu1 %v308_v24 }
 0x137   : > { %v346_v26 = vpop.f32.mrf.mxu1 }
 0x138   : > { %v347_v27 = vadd.f32 %v542_v25, %v346_v26 }
 0x13a   : > { %349 = vst [vmem:[%s274_s28] sm:$0xff] %v347_v27 }
 0x13b   : > { %660 = shalt.err (!%p657_p9)
}
 0x13c   : > { %482 = dma.vmem_to_hbm [thread:$0]  (%p808_p4), %s364_s29, 128, %s366_s30, %s351_s16  }
 0x13d PF: > { %s377_s22 = sand.u32 1, %s691_s18   ;;  %p906_p10 = scmp.ge.s32.totalorder %s703_s21, 2 }
 0x13e   : > { %s378_s9 = scalar_lea.sflag [#allocation4], %s377_s22 }
 0x13f   : > { %p496_p13 = pnand %p906_p10, %p812_p6 }
 0x141   : > { %p497_p11 = pneg %p496_p13 }
 0x143   : > { %686 = dma.done.wait (%p497_p11), %s378_s9, 128  }
 0x144   : > { %688 = vsyncadd (%p497_p11), %s378_s9, 4294967168  ;;  %p19_p0 = scmp.ge.s32.totalorder %s782_s12, 4   ;;  %s907_s18 = smov %s695_s19 }
 0x145   : > { %s908_s19 = smov %s699_s20  ;;  %s909_s20 = smov %s793_s15 }
 0x146   : > { %s910_s21 = smov %s782_s12  ;;  %21 = sbr.rel (!%p19_p0) target bundleno = 6 (0x6), region = 93 }
 0x14b   :  { %384 = vsyncpa [#allocation3], 1 }
 0x14c   :  { %386 = vsyncpa [#allocation3 + $0x1], 1 }
 0x14d   :  { %387 = vsyncpa [#allocation6], 1 }
 0x14e   :  { %388 = vsyncpa [#allocation4], 1 }
 0x14f   :  { %390 = vsyncpa [#allocation4 + $0x1], 1 }

</bundles_post_ra>
